<compile_context>
chip_gen: v6e
topology: v6e:2x2x1
jax: 0.10.0
libtpu: 0.0.40
codegen_flags: <defaults>
</compile_context>

<pallas_src>
import functools

import jax
import jax.numpy as jnp
from jax.experimental import pallas as pl
from jax.experimental.pallas import tpu as pltpu


_LANE = 128                               # vreg / VMEM lane width
_SUBLANE_ROWS = {4: 8, 2: 16, 1: 32}      # min row granularity per itemsize


def _round_up(a: int, b: int) -> int:
    return ((a + b - 1) // b) * b


@functools.lru_cache(maxsize=1)
def _vmem_budget_and_limit() -> tuple[int, int]:
    """(pipelined working-set budget, vmem_limit_bytes), sized per generation.

    v7x: 64 MiB VMEM/TC  -> ~22 MiB budget, ~38 MiB limit (headroom for Mosaic).
    v5e/v6e: 128 MiB     -> ~45 MiB budget, ~60 MiB limit (bigger tiles, fewer
    grid steps -> amortize the ~0.35 us per-step overhead).
    """
    cap = 64 * 1024 * 1024  # conservative default = v7x per-TC VMEM
    try:
        cap = int(pltpu.get_tpu_info().vmem_capacity_bytes)
    except Exception:
        pass
    budget = min(int(cap * 0.35), 48 * 1024 * 1024)
    limit = min(int(cap * 0.625), budget + 16 * 1024 * 1024)
    return budget, limit


def _pick_row_tile(rows: int, per_row_bytes: int, min_rows: int,
                   budget_bytes: int) -> int:
    """Largest row tile whose padded, buffered footprint fits the budget.

    Capped so large batches keep >= 2-4 grid steps (v7x dual-TC sharding of the
    'parallel' axis) while never dropping below ~512 rows per tile when the
    batch is large (per-step overhead amortization on v5e/v6e).
    """
    tb = budget_bytes // max(per_row_bytes, 1)
    parallel_cap = max(_round_up(pl.cdiv(rows, 4), min_rows), 512)
    tb = min(tb, parallel_cap, 2048, rows)
    tb = max(tb, min_rows)
    if tb >= rows:
        return rows                          # full-extent block: no divisibility need
    return max((tb // min_rows) * min_rows, min_rows)


def _sanitize_row_block(rb: int, rows: int, min_rows: int) -> int:
    """Clamp a user-provided row block to a legal (sublane-aligned) tile."""
    if rows <= min_rows:
        return rows
    rb = min(int(rb), rows)
    if rb >= rows:
        return rows
    return max((rb // min_rows) * min_rows, min_rows)


def _lane_dense_view(B: int, D: int, max_cols: int = 4096):
    """Pick (R, C) with R*C == B*D and C a multiple of 128 (prefer larger C)."""
    total = B * D
    if total % _LANE != 0:
        return None
    c = (min(total, max_cols) // _LANE) * _LANE
    while c >= _LANE:
        if total % c == 0:
            return total // c, c
        c -= _LANE
    return None


# -----------------------------------------------------------------------------
# Kernels
# -----------------------------------------------------------------------------

def _relu_hist_kernel(x_ref, hist_ref, out_ref, *, k: int):
    """Fused: write X_tile[:, :k] and ReLU(X_tile).

    Two independent ref reads (instead of one full-tile load reused twice) so
    the whole (TB, D) value is not live across the hist store -> no vreg-file
    pressure / VMEM spills at 512+ row tiles; the extra narrow vld is free in
    an HBM-bound kernel.
    """
    hist_ref[...] = x_ref[:, :k]
    out_ref[...] = jnp.maximum(x_ref[...], 0)


def _relu_kernel(x_ref, out_ref):
    out_ref[...] = jnp.maximum(x_ref[...], 0)


# -----------------------------------------------------------------------------
# pallas_call wrappers
# -----------------------------------------------------------------------------

def _make_in_spec(block_shape, input_buffers: int) -> pl.BlockSpec:
    if input_buffers != 2:
        # Deeper input pipeline; worth sweeping (input_buffers=3) on v5e where
        # exposed DMA latency is proportionally larger and VMEM is plentiful.
        return pl.BlockSpec(block_shape, lambda i: (i, 0),
                            pipeline_mode=pl.Buffered(input_buffers))
    return pl.BlockSpec(block_shape, lambda i: (i, 0))


def _fused_call(x, k: int, tb: int, input_buffers: int, vmem_limit: int):
    B, D = x.shape
    itemsize = jnp.dtype(x.dtype).itemsize
    cost = pl.CostEstimate(
        flops=B * D,                                     # one max per element
        transcendentals=0,
        bytes_accessed=(2 * B * D + B * k) * itemsize,   # read X, write out + hist
    )
    return pl.pallas_call(
        functools.partial(_relu_hist_kernel, k=k),
        out_shape=(
            jax.ShapeDtypeStruct((B, k), x.dtype),   # history: X[:, :k]
            jax.ShapeDtypeStruct((B, D), x.dtype),   # module(X) = relu(X)
        ),
        grid_spec=pl.GridSpec(
            grid=(pl.cdiv(B, tb),),
            in_specs=[_make_in_spec((tb, D), input_buffers)],
            out_specs=(
                pl.BlockSpec((tb, k), lambda i: (i, 0)),
                pl.BlockSpec((tb, D), lambda i: (i, 0)),
            ),
        ),
        compiler_params=pltpu.CompilerParams(
            dimension_semantics=("parallel",),       # shard rows over v7x's 2 TCs
            vmem_limit_bytes=vmem_limit,
        ),
        cost_estimate=cost,
    )(x)


def _relu_call(x2d, tb: int, input_buffers: int, vmem_limit: int):
    R, C = x2d.shape
    itemsize = jnp.dtype(x2d.dtype).itemsize
    cost = pl.CostEstimate(
        flops=R * C, transcendentals=0, bytes_accessed=2 * R * C * itemsize)
    return pl.pallas_call(
        _relu_kernel,
        out_shape=jax.ShapeDtypeStruct((R, C), x2d.dtype),
        grid_spec=pl.GridSpec(
            grid=(pl.cdiv(R, tb),),
            in_specs=[_make_in_spec((tb, C), input_buffers)],
            out_specs=pl.BlockSpec((tb, C), lambda i: (i, 0)),
        ),
        compiler_params=pltpu.CompilerParams(
            dimension_semantics=("parallel",),
            vmem_limit_bytes=vmem_limit,
        ),
        cost_estimate=cost,
    )(x2d)


# -----------------------------------------------------------------------------
# Public forward
# -----------------------------------------------------------------------------

@functools.partial(jax.jit, static_argnames=("k", "row_block", "input_buffers"))
def activation_visualizer_forward(x: jax.Array, k: int,
                                  row_block: int | None = None,
                                  input_buffers: int = 2):
    """Fused forward: returns (history slice X[:, :k], relu(X))."""
    B, D = x.shape
    itemsize = jnp.dtype(x.dtype).itemsize
    min_rows = _SUBLANE_ROWS.get(itemsize, 8)
    budget, vmem_limit = _vmem_budget_and_limit()

    # Mirror torch slicing: X[:, :k] silently clamps; k <= 0 yields empty slice.
    k_eff = max(0, min(int(k), D))

    # Padded VMEM footprint per tile row (lane padding to 128, input buffered
    # `input_buffers` deep, outputs double-buffered).
    d_pad = _round_up(D, _LANE)
    k_pad = _round_up(k_eff, _LANE) if k_eff > 0 else 0
    per_row_fused = (input_buffers * d_pad + 2 * (d_pad + k_pad)) * itemsize

    fused_ok = (
        k_eff > 0
        and D % _LANE == 0                        # lane-dense outputs, no vst.msk
        and min_rows * per_row_fused <= budget    # fits even at the smallest tile
    )

    if fused_ok:
        if row_block is None:
            tb = _pick_row_tile(B, per_row_fused, min_rows, budget)
        else:
            tb = _sanitize_row_block(row_block, B, min_rows)
        return _fused_call(x, k_eff, tb, input_buffers, vmem_limit)

    # --------------------------------------------------------------------
    # Fallback: D not a multiple of 128 (masked partial stores) or very wide
    # activations whose (min_rows, D) tile would overflow VMEM (v7x, 64 MiB).
    # The history slice is tiny (B*k elements) -> plain XLA slice; the ReLU
    # streams over a lane-dense reshaped slab of the same contiguous data.
    # --------------------------------------------------------------------
    hist = x[:, :k_eff]
    view = _lane_dense_view(B, D)
    if view is not None:
        R, C = view
        x2 = x.reshape(R, C)
    else:
        # B*D not a multiple of 128: keep the native layout; last-dim blocks
        # span full D (masked stores unavoidable for this shape) but still row-tile.
        R, C = B, D
        x2 = x
    per_row_relu = (input_buffers + 2) * _round_up(C, _LANE) * itemsize
    if row_block is None:
        tb = _pick_row_tile(R, per_row_relu, min_rows, budget)
    else:
        tb = _sanitize_row_block(row_block, R, min_rows)
    out = _relu_call(x2, tb, input_buffers, vmem_limit)
    if x2.shape != (B, D):
        out = out.reshape(B, D)
    return hist, out


class ActivationVisualizer:
    """JAX/Pallas port of the PyTorch ActivationVisualizer (forward only).

    Stores the first-k-feature (pre-activation) slice of every input it sees
    and returns the wrapped module's output (ReLU) computed by the Pallas
    kernel.  The host transfer of the history slice is started asynchronously
    and only materialized to numpy on demand, so the hot path is not stalled.
    Plotting methods (visualize / matplotlib) are host-side and out of scope.
    """

    def __init__(self, k: int):
        self.k = k
        self.history = []     # device arrays; D2H copies started asynchronously

    def forward(self, x: jax.Array) -> jax.Array:
        hist_slice, out = activation_visualizer_forward(x, self.k)
        # Mirror `.clone().detach().cpu().numpy()` without a blocking sync.
        try:
            hist_slice.copy_to_host_async()
        except AttributeError:
            pass
        self.history.append(hist_slice)
        return out

    def history_numpy(self):
        """Materialize stored history slices as host numpy arrays."""
        return [jax.device_get(h) for h in self.history]

    def reset(self):
        self.history = []


if __name__ == "__main__":
    key = jax.random.PRNGKey(0)

    # --- Small non-lane-aligned case (hidden=32): exercises the lane-dense
    #     reshape fallback (hist via XLA slice, ReLU over a (R, 128*m) slab).
    B, D, K = 8, 32, 4
    x = jax.random.normal(key, (B, D), dtype=jnp.float32)
    viz = ActivationVisualizer(k=K)
    y = jax.block_until_ready(viz.forward(x))
    hist_np = viz.history_numpy()[0]
    assert hist_np.shape == (B, K)
    assert y.shape == (B, D)
    assert jnp.allclose(jnp.asarray(hist_np), x[:, :K])
    assert jnp.allclose(y, jnp.maximum(x, 0.0))

    # --- Lane-aligned fused path with an explicit multi-step grid
    #     (3 row blocks, ragged last block handled by Pallas masking).
    B2, D2, K2 = 20, 128, 4
    x2 = jax.random.normal(jax.random.PRNGKey(1), (B2, D2), dtype=jnp.float32)
    h2, y2 = activation_visualizer_forward(x2, K2, row_block=8)
    h2, y2 = jax.block_until_ready((h2, y2))
    assert jnp.allclose(h2, x2[:, :K2])
    assert jnp.allclose(y2, jnp.maximum(x2, 0.0))

    # --- Auto-tiled fused path (default, budget/padding-aware tile choice).
    B3, D3, K3 = 64, 256, 8
    x3 = jax.random.normal(jax.random.PRNGKey(2), (B3, D3), dtype=jnp.float32)
    h3, y3 = activation_visualizer_forward(x3, K3)
    h3, y3 = jax.block_until_ready((h3, y3))
    assert jnp.allclose(h3, x3[:, :K3])
    assert jnp.allclose(y3, jnp.maximum(x3, 0.0))

    print("KERNEL_OK")
</pallas_src>

<mosaic_0001>
module attributes {stable_mosaic.version = 11 : i64} {
  func.func @_relu_kernel(%arg0: i32, %arg1: memref<1x256xf32, #tpu.memory_space<vmem>>, %arg2: memref<1x256xf32, #tpu.memory_space<vmem>>) attributes {dimension_semantics = [#tpu.dimension_semantics<parallel>], iteration_bounds = array<i64: 1>, scalar_prefetch = 0 : i64, scratch_operands = 0 : i64, tpu.core_type = #tpu.core_type<tc>, window_params = [{transform_indices = @transform_0, window_bounds = array<i64: 1, 256>}, {transform_indices = @transform_1, window_bounds = array<i64: 1, 256>}]} {
    %c0 = arith.constant 0 : index
    %c0_0 = arith.constant 0 : index
    %0 = vector.load %arg1[%c0, %c0_0] : memref<1x256xf32, #tpu.memory_space<vmem>>, vector<1x256xf32>
    %cst = arith.constant 0.000000e+00 : f32
    %1 = vector.broadcast %cst : f32 to vector<1x256xf32>
    %2 = arith.maximumf %0, %1 : vector<1x256xf32>
    %c0_1 = arith.constant 0 : index
    %c0_2 = arith.constant 0 : index
    %3 = vector.load %arg2[%c0_1, %c0_2] : memref<1x256xf32, #tpu.memory_space<vmem>>, vector<1x256xf32>
    tpu.vector_store %arg2[%c0_1, %c0_2], %2 {strides = array<i32>} : memref<1x256xf32, #tpu.memory_space<vmem>>, vector<1x256xf32>,
    return
  }
  func.func @transform_0(%arg0: i32) -> (i32, i32) {
    %c0_i32 = arith.constant 0 : i32
    %c0_i32_0 = arith.constant 0 : i32
    return %arg0, %c0_i32 : i32, i32
  }
  func.func @transform_1(%arg0: i32) -> (i32, i32) {
    %c0_i32 = arith.constant 0 : i32
    %c0_i32_0 = arith.constant 0 : i32
    return %arg0, %c0_i32 : i32, i32
  }
}

</mosaic_0001>

<bundles_post_ra>
// kernel: activation_visualizer_forward.1
= control target key start
LH: loop header
LB: loop body
LE: loop exit
PB: predicated region body
PF: predicated region fallthrough
CT: control target
= control target key end

     0   :  { %v10_v0 = vlaneseq  ;;  %s35_s0 = inlined_call_operand.vmem [shape: f32[1,256], index: 0, kind: input, shape index: {}]   ;;  %s36_s1 = inlined_call_operand.vmem [shape: f32[1,256], index: 1, kind: output, shape index: {}]  }
   0x1   :  { %v8_v1 = vld [vmem:[%s35_s0] sm:$0x3] }
   0x2   :  { %v9_v2 = vmax.f32 %v8_v1, 0.0  ;;  %vm12_vm0 = vcmp.lt.s32.totalorder %v10_v0, 256 }
   0x4   :  { %14 = vst.msk [vmem:[%s36_s1] sm:$0x3] %vm12_vm0, %v9_v2 }

</bundles_post_ra>
